<compile_context>
chip_gen: v7x
topology: tpu7x:2x2x1
jax: 0.10.0
libtpu: 0.0.40
codegen_flags: <defaults>
</compile_context>

<pallas_src>
import functools
import math

import jax
import jax.numpy as jnp
from jax import lax
from jax.experimental import pallas as pl
from jax.experimental.pallas import tpu as pltpu


# ------------------------------ fused kernel --------------------------------

def _make_fused_kernel(encoder_num, patch_size, d_model, P0):
    """Builds the fused per-(b, v) Encoder_map forward kernel."""
    n_in = 3 + 2 * encoder_num + 5 * (encoder_num - 1) + 2

    def kernel(*refs):
        in_refs, out_refs = refs[:n_in], refs[n_in:]
        it = iter(in_refs)
        x_ref = next(it)
        w_emb_ref, b_emb_ref = next(it), next(it)
        w1 = [next(it) for _ in range(encoder_num)]
        b1 = [next(it) for _ in range(encoder_num)]
        w2 = [next(it) for _ in range(encoder_num - 1)]
        b2 = [next(it) for _ in range(encoder_num - 1)]
        w3a = [next(it) for _ in range(encoder_num - 1)]
        w3b = [next(it) for _ in range(encoder_num - 1)]
        b3 = [next(it) for _ in range(encoder_num - 1)]
        gamma_ref, beta_ref = next(it), next(it)

        v = pl.program_id(1)                 # variable index for RevIN affine
        gamma_v = gamma_ref[v]               # scalar read from SMEM
        beta_v = beta_ref[v]

        # DataEmbedding approximated as Linear(patch_size -> d_model).
        # TODO(synk): substitute real DataEmbedding once its definition is known.
        xp = x_ref[...].reshape(P0, patch_size)                       # (P0, patch)
        x_enc = jnp.dot(xp, w_emb_ref[...],
                        preferred_element_type=jnp.float32) + b_emb_ref[...]

        p_cur = P0
        for i in range(encoder_num):
            n_i = patch_size * (2 ** i)
            # TODO(synk): encoders1 / encoders2 (Encoder_Cross) treated as identity.

            # linear1[i]; Flatten(start_dim=2) is realized by the row-major
            # (p_cur, n_i) output block (reshaped to (B, V, L) outside for free).
            y = jnp.dot(x_enc, w1[i][...],
                        preferred_element_type=jnp.float32) + b1[i][...]
            out_refs[i][...] = y.reshape(1, 1, p_cur, n_i)

            if i != encoder_num - 1:
                # RevIN 'norm': per-(b, v) stats over the flattened length L,
                # computed in-layout (no transposes), biased var, eps = 1e-5.
                inv_n = 1.0 / float(p_cur * n_i)
                mean = jnp.sum(jnp.sum(y, axis=-1, keepdims=True),
                               axis=0, keepdims=True) * inv_n          # (1, 1)
                centered = y - mean
                var = jnp.sum(jnp.sum(centered * centered, axis=-1, keepdims=True),
                              axis=0, keepdims=True) * inv_n           # (1, 1)
                xn = centered * lax.rsqrt(var + 1e-5)
                xn = xn * gamma_v + beta_v

                # linear2[i]: (p_cur, n_i) @ (n_i, D) + b2
                z = jnp.dot(xn, w2[i][...],
                            preferred_element_type=jnp.float32) + b2[i][...]

                # view(P, D)->(P//2, 2D) then linear3[i]:
                #   out[j] = z[2j] @ W3[:D] + z[2j+1] @ W3[D:] + b3
                # realized with even/odd row-selection matmuls (MXU), so no
                # in-kernel relayout reshape is needed.
                half = p_cur // 2
                col = lax.broadcasted_iota(jnp.int32, (half, p_cur), 1)
                two_row = 2 * lax.broadcasted_iota(jnp.int32, (half, p_cur), 0)
                sel_even = (col == two_row).astype(jnp.float32)
                sel_odd = (col == two_row + 1).astype(jnp.float32)
                z_even = jnp.dot(sel_even, z, preferred_element_type=jnp.float32)
                z_odd = jnp.dot(sel_odd, z, preferred_element_type=jnp.float32)
                x_enc = (jnp.dot(z_even, w3a[i][...],
                                 preferred_element_type=jnp.float32)
                         + jnp.dot(z_odd, w3b[i][...],
                                   preferred_element_type=jnp.float32)
                         + b3[i][...])                                  # (half, D)
                p_cur = half

    return kernel


# ------------------------- parameter initialization -------------------------

def _init_linear(key, fan_in, fan_out):
    k1, k2 = jax.random.split(key)
    bound = 1.0 / math.sqrt(fan_in)
    W = jax.random.uniform(k1, (fan_in, fan_out), jnp.float32, -bound, bound)
    b = jax.random.uniform(k2, (1, fan_out), jnp.float32, -bound, bound)
    return W, b


def init_params(key, patch_size, d_model, encoder_num, n_vars):
    keys = jax.random.split(key, 1 + 3 * encoder_num)
    params = {"W1": [], "b1": [], "W2": [], "b2": [],
              "W3a": [], "W3b": [], "b3": []}
    params["W_emb"], params["b_emb"] = _init_linear(keys[0], patch_size, d_model)
    for i in range(encoder_num):
        W, b = _init_linear(keys[1 + i], d_model, patch_size * 2 ** i)
        params["W1"].append(W)
        params["b1"].append(b)
    for i in range(encoder_num - 1):
        W, b = _init_linear(keys[1 + encoder_num + i], patch_size * 2 ** i, d_model)
        params["W2"].append(W)
        params["b2"].append(b)
        W3, b3 = _init_linear(keys[1 + 2 * encoder_num + i], 2 * d_model, d_model)
        params["W3a"].append(W3[:d_model])     # pre-split: rows for z[2j]
        params["W3b"].append(W3[d_model:])     # pre-split: rows for z[2j+1]
        params["b3"].append(b3)
    # RevIN affine parameters (per variable).
    params["revin_gamma"] = jnp.ones((n_vars,), jnp.float32)
    params["revin_beta"] = jnp.zeros((n_vars,), jnp.float32)
    return params


# ------------------------------- forward pass -------------------------------

def encoder_map_forward(x, var_ccc, params, *, patch_size, d_model, encoder_num):
    """Mirrors Encoder_map.forward + Encoder_process.forward (fused kernel)."""
    del var_ccc  # consumed only by Encoder_Cross (identity here)
    B, L, V = x.shape
    assert L % patch_size == 0
    P0 = L // patch_size
    assert P0 % (2 ** (encoder_num - 1)) == 0

    # (B, L, V) -> (B, V, P0, patch): the only relayout done outside the kernel.
    x_bvpp = jnp.transpose(x, (0, 2, 1)).reshape(B, V, P0, patch_size)

    def const_spec(arr):
        nd = arr.ndim
        return pl.BlockSpec(arr.shape, lambda b, v: (0,) * nd)

    inputs = [x_bvpp, params["W_emb"], params["b_emb"]]
    in_specs = [
        pl.BlockSpec((1, 1, P0, patch_size), lambda b, v: (b, v, 0, 0)),
        const_spec(params["W_emb"]),
        const_spec(params["b_emb"]),
    ]
    for key in ("W1", "b1"):
        for i in range(encoder_num):
            inputs.append(params[key][i])
            in_specs.append(const_spec(params[key][i]))
    for key in ("W2", "b2", "W3a", "W3b", "b3"):
        for i in range(encoder_num - 1):
            inputs.append(params[key][i])
            in_specs.append(const_spec(params[key][i]))
    smem_spec = pl.BlockSpec(memory_space=pltpu.MemorySpace.SMEM)
    inputs += [params["revin_gamma"], params["revin_beta"]]
    in_specs += [smem_spec, smem_spec]

    out_shapes, out_specs = [], []
    p = P0
    for i in range(encoder_num):
        n_i = patch_size * 2 ** i
        out_shapes.append(jax.ShapeDtypeStruct((B, V, p, n_i), jnp.float32))
        out_specs.append(pl.BlockSpec((1, 1, p, n_i), lambda b, v: (b, v, 0, 0)))
        p //= 2

    # Advisory cost estimate (lets XLA schedule around the custom call).
    flops_bv = 2 * P0 * patch_size * d_model
    p = P0
    for i in range(encoder_num):
        n_i = patch_size * 2 ** i
        flops_bv += 2 * p * d_model * n_i                        # linear1
        if i != encoder_num - 1:
            flops_bv += 2 * p * n_i * d_model                    # linear2
            flops_bv += 2 * (p // 2) * p * d_model * 2           # even/odd select
            flops_bv += 2 * (p // 2) * (2 * d_model) * d_model   # linear3
            p //= 2
    cost = pl.CostEstimate(
        flops=int(B * V * flops_bv),
        transcendentals=int(B * V * max(encoder_num - 1, 0)),
        bytes_accessed=int(4 * (sum(int(a.size) for a in inputs)
                                + B * V * L * encoder_num)),
    )

    kernel = _make_fused_kernel(encoder_num, patch_size, d_model, P0)
    outs = pl.pallas_call(
        kernel,
        grid=(B, V),
        in_specs=in_specs,
        out_specs=tuple(out_specs),
        out_shape=tuple(out_shapes),
        compiler_params=pltpu.CompilerParams(
            dimension_semantics=("parallel", "parallel")),
        cost_estimate=cost,
    )(*inputs)

    # Row-major contiguous reshape -> (B, V, L); no data movement required.
    return [o.reshape(B, V, L) for o in outs]


# --------------------------- pure-JAX reference ------------------------------

def encoder_map_reference(x, params, *, patch_size, d_model, encoder_num):
    hp = lax.Precision.HIGHEST
    B, L, V = x.shape
    P = L // patch_size
    xp = jnp.transpose(x, (0, 2, 1)).reshape(B, V, P, patch_size)
    x_enc = jnp.einsum("bvps,sd->bvpd", xp, params["W_emb"],
                       precision=hp) + params["b_emb"]
    gamma = params["revin_gamma"][None, :, None]
    beta = params["revin_beta"][None, :, None]
    outs = []
    for i in range(encoder_num):
        Pc = x_enc.shape[2]
        n_i = patch_size * 2 ** i
        y = jnp.einsum("bvpd,dn->bvpn", x_enc, params["W1"][i],
                       precision=hp) + params["b1"][i]
        x_cur = y.reshape(B, V, Pc * n_i)
        outs.append(x_cur)
        if i != encoder_num - 1:
            mean = jnp.mean(x_cur, axis=-1, keepdims=True)
            var = jnp.mean((x_cur - mean) ** 2, axis=-1, keepdims=True)
            xn = (x_cur - mean) * lax.rsqrt(var + 1e-5)
            xn = xn * gamma + beta
            z = jnp.einsum("bvpn,nd->bvpd", xn.reshape(B, V, Pc, n_i),
                           params["W2"][i], precision=hp) + params["b2"][i]
            w3 = jnp.concatenate([params["W3a"][i], params["W3b"][i]], axis=0)
            z2 = z.reshape(B, V, Pc // 2, 2 * d_model)
            x_enc = jnp.einsum("bvpk,kd->bvpd", z2, w3,
                               precision=hp) + params["b3"][i]
    return outs


# ----------------------------------- main ------------------------------------

if __name__ == "__main__":
    # Module defaults: encoder_layer=3, patch_size=12, d_model=4;
    # B=2, V=3, L=96 (P=8, divisible by 2**(encoder_num-1)).
    B, L, V = 2, 96, 3
    patch_size, d_model, encoder_num = 12, 4, 3

    key = jax.random.PRNGKey(0)
    k_x, k_c, k_p, k_g, k_b = jax.random.split(key, 5)
    x = jax.random.normal(k_x, (B, L, V), jnp.float32)
    var_ccc = jax.random.normal(k_c, (B, encoder_num, V), jnp.float32)
    params = init_params(k_p, patch_size, d_model, encoder_num, V)
    # Non-trivial RevIN affine params (test-only) so the per-variable path is
    # actually exercised against the reference.
    params["revin_gamma"] = 1.0 + 0.1 * jax.random.normal(k_g, (V,), jnp.float32)
    params["revin_beta"] = 0.1 * jax.random.normal(k_b, (V,), jnp.float32)

    fwd = jax.jit(functools.partial(
        encoder_map_forward, patch_size=patch_size, d_model=d_model,
        encoder_num=encoder_num))
    outs = fwd(x, var_ccc, params)
    outs = [jax.block_until_ready(o) for o in outs]

    refs = encoder_map_reference(x, params, patch_size=patch_size,
                                 d_model=d_model, encoder_num=encoder_num)

    assert len(outs) == encoder_num
    for o, r in zip(outs, refs):
        assert o.shape == (B, V, L), o.shape
        assert bool(jnp.all(jnp.isfinite(o)))
        err = float(jnp.max(jnp.abs(o - r)))
        assert err < 2e-2, f"mismatch vs reference: {err}"
    print("KERNEL_OK")
</pallas_src>

<mosaic_0001>
module attributes {stable_mosaic.version = 11 : i64} {
  func.func @kernel(%arg0: i32, %arg1: i32, %arg2: memref<1x1x8x12xf32, #tpu.memory_space<vmem>>, %arg3: memref<12x4xf32, #tpu.memory_space<vmem>>, %arg4: memref<1x4xf32, #tpu.memory_space<vmem>>, %arg5: memref<4x12xf32, #tpu.memory_space<vmem>>, %arg6: memref<4x24xf32, #tpu.memory_space<vmem>>, %arg7: memref<4x48xf32, #tpu.memory_space<vmem>>, %arg8: memref<1x12xf32, #tpu.memory_space<vmem>>, %arg9: memref<1x24xf32, #tpu.memory_space<vmem>>, %arg10: memref<1x48xf32, #tpu.memory_space<vmem>>, %arg11: memref<12x4xf32, #tpu.memory_space<vmem>>, %arg12: memref<24x4xf32, #tpu.memory_space<vmem>>, %arg13: memref<1x4xf32, #tpu.memory_space<vmem>>, %arg14: memref<1x4xf32, #tpu.memory_space<vmem>>, %arg15: memref<4x4xf32, #tpu.memory_space<vmem>>, %arg16: memref<4x4xf32, #tpu.memory_space<vmem>>, %arg17: memref<4x4xf32, #tpu.memory_space<vmem>>, %arg18: memref<4x4xf32, #tpu.memory_space<vmem>>, %arg19: memref<1x4xf32, #tpu.memory_space<vmem>>, %arg20: memref<1x4xf32, #tpu.memory_space<vmem>>, %arg21: memref<3xf32, #tpu.memory_space<smem>>, %arg22: memref<3xf32, #tpu.memory_space<smem>>, %arg23: memref<1x1x8x12xf32, #tpu.memory_space<vmem>>, %arg24: memref<1x1x4x24xf32, #tpu.memory_space<vmem>>, %arg25: memref<1x1x2x48xf32, #tpu.memory_space<vmem>>) attributes {dimension_semantics = [#tpu.dimension_semantics<parallel>, #tpu.dimension_semantics<parallel>], iteration_bounds = array<i64: 2, 3>, scalar_prefetch = 0 : i64, scratch_operands = 0 : i64, tpu.core_type = #tpu.core_type<tc>, window_params = [{transform_indices = @transform_0, window_bounds = array<i64: 1, 1, 8, 12>}, {pipeline_mode = #tpu.pipeline_mode<synchronous>, transform_indices = @transform_1, window_bounds = array<i64: 12, 4>}, {pipeline_mode = #tpu.pipeline_mode<synchronous>, transform_indices = @transform_2, window_bounds = array<i64: 1, 4>}, {pipeline_mode = #tpu.pipeline_mode<synchronous>, transform_indices = @transform_3, window_bounds = array<i64: 4, 12>}, {pipeline_mode = #tpu.pipeline_mode<synchronous>, transform_indices = @transform_4, window_bounds = array<i64: 4, 24>}, {pipeline_mode = #tpu.pipeline_mode<synchronous>, transform_indices = @transform_5, window_bounds = array<i64: 4, 48>}, {pipeline_mode = #tpu.pipeline_mode<synchronous>, transform_indices = @transform_6, window_bounds = array<i64: 1, 12>}, {pipeline_mode = #tpu.pipeline_mode<synchronous>, transform_indices = @transform_7, window_bounds = array<i64: 1, 24>}, {pipeline_mode = #tpu.pipeline_mode<synchronous>, transform_indices = @transform_8, window_bounds = array<i64: 1, 48>}, {pipeline_mode = #tpu.pipeline_mode<synchronous>, transform_indices = @transform_9, window_bounds = array<i64: 12, 4>}, {pipeline_mode = #tpu.pipeline_mode<synchronous>, transform_indices = @transform_10, window_bounds = array<i64: 24, 4>}, {pipeline_mode = #tpu.pipeline_mode<synchronous>, transform_indices = @transform_11, window_bounds = array<i64: 1, 4>}, {pipeline_mode = #tpu.pipeline_mode<synchronous>, transform_indices = @transform_12, window_bounds = array<i64: 1, 4>}, {pipeline_mode = #tpu.pipeline_mode<synchronous>, transform_indices = @transform_13, window_bounds = array<i64: 4, 4>}, {pipeline_mode = #tpu.pipeline_mode<synchronous>, transform_indices = @transform_14, window_bounds = array<i64: 4, 4>}, {pipeline_mode = #tpu.pipeline_mode<synchronous>, transform_indices = @transform_15, window_bounds = array<i64: 4, 4>}, {pipeline_mode = #tpu.pipeline_mode<synchronous>, transform_indices = @transform_16, window_bounds = array<i64: 4, 4>}, {pipeline_mode = #tpu.pipeline_mode<synchronous>, transform_indices = @transform_17, window_bounds = array<i64: 1, 4>}, {pipeline_mode = #tpu.pipeline_mode<synchronous>, transform_indices = @transform_18, window_bounds = array<i64: 1, 4>}, {transform_indices = @transform_19, window_bounds = array<i64: 3>}, {transform_indices = @transform_20, window_bounds = array<i64: 3>}, {transform_indices = @transform_21, window_bounds = array<i64: 1, 1, 8, 12>}, {transform_indices = @transform_22, window_bounds = array<i64: 1, 1, 4, 24>}, {transform_indices = @transform_23, window_bounds = array<i64: 1, 1, 2, 48>}]} {
    %0 = arith.index_cast %arg1 : i32 to index
    %1 = memref.load %arg21[%0] : memref<3xf32, #tpu.memory_space<smem>>
    %2 = arith.index_cast %arg1 : i32 to index
    %3 = memref.load %arg22[%2] : memref<3xf32, #tpu.memory_space<smem>>
    %c0 = arith.constant 0 : index
    %c0_0 = arith.constant 0 : index
    %c0_1 = arith.constant 0 : index
    %c0_2 = arith.constant 0 : index
    %4 = vector.load %arg2[%c0, %c0_0, %c0_1, %c0_2] : memref<1x1x8x12xf32, #tpu.memory_space<vmem>>, vector<1x1x8x12xf32>
    %5 = vector.shape_cast %4 : vector<1x1x8x12xf32> to vector<8x12xf32>
    %c0_3 = arith.constant 0 : index
    %c0_4 = arith.constant 0 : index
    %6 = vector.load %arg3[%c0_3, %c0_4] : memref<12x4xf32, #tpu.memory_space<vmem>>, vector<12x4xf32>
    %cst = arith.constant dense<0.000000e+00> : vector<8x4xf32>
    %7 = tpu.matmul %5, %6, %cst {dimension_numbers = #tpu.dot_dimension_numbers<[1], [0], [0], [1], [0, 0, 1, 1], [], []>} : vector<8x12xf32>, vector<12x4xf32>, vector<8x4xf32> -> vector<8x4xf32>
    %c0_5 = arith.constant 0 : index
    %c0_6 = arith.constant 0 : index
    %8 = vector.load %arg4[%c0_5, %c0_6] : memref<1x4xf32, #tpu.memory_space<vmem>>, vector<1x4xf32>
    %9 = vector.broadcast %8 : vector<1x4xf32> to vector<8x4xf32>
    %10 = arith.addf %7, %9 : vector<8x4xf32>
    %c0_7 = arith.constant 0 : index
    %c0_8 = arith.constant 0 : index
    %11 = vector.load %arg5[%c0_7, %c0_8] : memref<4x12xf32, #tpu.memory_space<vmem>>, vector<4x12xf32>
    %cst_9 = arith.constant dense<0.000000e+00> : vector<8x12xf32>
    %12 = tpu.matmul %10, %11, %cst_9 {dimension_numbers = #tpu.dot_dimension_numbers<[1], [0], [0], [1], [0, 0, 1, 1], [], []>} : vector<8x4xf32>, vector<4x12xf32>, vector<8x12xf32> -> vector<8x12xf32>
    %c0_10 = arith.constant 0 : index
    %c0_11 = arith.constant 0 : index
    %13 = vector.load %arg8[%c0_10, %c0_11] : memref<1x12xf32, #tpu.memory_space<vmem>>, vector<1x12xf32>
    %14 = vector.broadcast %13 : vector<1x12xf32> to vector<8x12xf32>
    %15 = arith.addf %12, %14 : vector<8x12xf32>
    %16 = vector.shape_cast %15 : vector<8x12xf32> to vector<1x1x8x12xf32>
    %c0_12 = arith.constant 0 : index
    %c0_13 = arith.constant 0 : index
    %c0_14 = arith.constant 0 : index
    %c0_15 = arith.constant 0 : index
    %17 = vector.load %arg23[%c0_12, %c0_13, %c0_14, %c0_15] : memref<1x1x8x12xf32, #tpu.memory_space<vmem>>, vector<1x1x8x12xf32>
    tpu.vector_store %arg23[%c0_12, %c0_13, %c0_14, %c0_15], %16 {strides = array<i32>} : memref<1x1x8x12xf32, #tpu.memory_space<vmem>>, vector<1x1x8x12xf32>,
    %cst_16 = arith.constant dense<0.000000e+00> : vector<8xf32>
    %18 = vector.multi_reduction <add>, %15, %cst_16 [1] : vector<8x12xf32> to vector<8xf32>
    %19 = vector.shape_cast %18 : vector<8xf32> to vector<8x1xf32>
    %cst_17 = arith.constant dense<0.000000e+00> : vector<1xf32>
    %20 = vector.multi_reduction <add>, %19, %cst_17 [0] : vector<8x1xf32> to vector<1xf32>
    %21 = vector.shape_cast %20 : vector<1xf32> to vector<1x1xf32>
    %cst_18 = arith.constant 0.010416667 : f32
    %22 = vector.broadcast %cst_18 : f32 to vector<1x1xf32>
    %23 = arith.mulf %21, %22 : vector<1x1xf32>
    %24 = vector.broadcast %23 : vector<1x1xf32> to vector<8x12xf32>
    %25 = arith.subf %15, %24 : vector<8x12xf32>
    %26 = arith.mulf %25, %25 : vector<8x12xf32>
    %cst_19 = arith.constant dense<0.000000e+00> : vector<8xf32>
    %27 = vector.multi_reduction <add>, %26, %cst_19 [1] : vector<8x12xf32> to vector<8xf32>
    %28 = vector.shape_cast %27 : vector<8xf32> to vector<8x1xf32>
    %cst_20 = arith.constant dense<0.000000e+00> : vector<1xf32>
    %29 = vector.multi_reduction <add>, %28, %cst_20 [0] : vector<8x1xf32> to vector<1xf32>
    %30 = vector.shape_cast %29 : vector<1xf32> to vector<1x1xf32>
    %cst_21 = arith.constant 0.010416667 : f32
    %31 = vector.broadcast %cst_21 : f32 to vector<1x1xf32>
    %32 = arith.mulf %30, %31 : vector<1x1xf32>
    %cst_22 = arith.constant 9.99999974E-6 : f32
    %33 = vector.broadcast %cst_22 : f32 to vector<1x1xf32>
    %34 = arith.addf %32, %33 : vector<1x1xf32>
    %35 = math.rsqrt %34 : vector<1x1xf32>
    %36 = vector.broadcast %35 : vector<1x1xf32> to vector<8x12xf32>
    %37 = arith.mulf %25, %36 : vector<8x12xf32>
    %38 = vector.broadcast %1 : f32 to vector<8x12xf32>
    %39 = arith.mulf %37, %38 : vector<8x12xf32>
    %40 = vector.broadcast %3 : f32 to vector<8x12xf32>
    %41 = arith.addf %39, %40 : vector<8x12xf32>
    %c0_23 = arith.constant 0 : index
    %c0_24 = arith.constant 0 : index
    %42 = vector.load %arg11[%c0_23, %c0_24] : memref<12x4xf32, #tpu.memory_space<vmem>>, vector<12x4xf32>
    %cst_25 = arith.constant dense<0.000000e+00> : vector<8x4xf32>
    %43 = tpu.matmul %41, %42, %cst_25 {dimension_numbers = #tpu.dot_dimension_numbers<[1], [0], [0], [1], [0, 0, 1, 1], [], []>} : vector<8x12xf32>, vector<12x4xf32>, vector<8x4xf32> -> vector<8x4xf32>
    %c0_26 = arith.constant 0 : index
    %c0_27 = arith.constant 0 : index
    %44 = vector.load %arg13[%c0_26, %c0_27] : memref<1x4xf32, #tpu.memory_space<vmem>>, vector<1x4xf32>
    %45 = vector.broadcast %44 : vector<1x4xf32> to vector<8x4xf32>
    %46 = arith.addf %43, %45 : vector<8x4xf32>
    %47 = tpu.iota {dimensions = array<i32: 1>} : vector<4x8xi32>
    %48 = tpu.iota {dimensions = array<i32: 0>} : vector<4x8xi32>
    %c2_i32 = arith.constant 2 : i32
    %49 = vector.broadcast %c2_i32 : i32 to vector<4x8xi32>
    %50 = arith.muli %49, %48 : vector<4x8xi32>
    %51 = arith.cmpi eq, %47, %50 : vector<4x8xi32>
    %52 = arith.extui %51 : vector<4x8xi1> to vector<4x8xi32>
    %53 = arith.sitofp %52 : vector<4x8xi32> to vector<4x8xf32>
    %c1_i32 = arith.constant 1 : i32
    %54 = vector.broadcast %c1_i32 : i32 to vector<4x8xi32>
    %55 = arith.addi %50, %54 : vector<4x8xi32>
    %56 = arith.cmpi eq, %47, %55 : vector<4x8xi32>
    %57 = arith.extui %56 : vector<4x8xi1> to vector<4x8xi32>
    %58 = arith.sitofp %57 : vector<4x8xi32> to vector<4x8xf32>
    %cst_28 = arith.constant dense<0.000000e+00> : vector<4x4xf32>
    %59 = tpu.matmul %53, %46, %cst_28 {dimension_numbers = #tpu.dot_dimension_numbers<[1], [0], [0], [1], [0, 0, 1, 1], [], []>} : vector<4x8xf32>, vector<8x4xf32>, vector<4x4xf32> -> vector<4x4xf32>
    %cst_29 = arith.constant dense<0.000000e+00> : vector<4x4xf32>
    %60 = tpu.matmul %58, %46, %cst_29 {dimension_numbers = #tpu.dot_dimension_numbers<[1], [0], [0], [1], [0, 0, 1, 1], [], []>} : vector<4x8xf32>, vector<8x4xf32>, vector<4x4xf32> -> vector<4x4xf32>
    %c0_30 = arith.constant 0 : index
    %c0_31 = arith.constant 0 : index
    %61 = vector.load %arg15[%c0_30, %c0_31] : memref<4x4xf32, #tpu.memory_space<vmem>>, vector<4x4xf32>
    %cst_32 = arith.constant dense<0.000000e+00> : vector<4x4xf32>
    %62 = tpu.matmul %59, %61, %cst_32 {dimension_numbers = #tpu.dot_dimension_numbers<[1], [0], [0], [1], [0, 0, 1, 1], [], []>} : vector<4x4xf32>, vector<4x4xf32>, vector<4x4xf32> -> vector<4x4xf32>
    %c0_33 = arith.constant 0 : index
    %c0_34 = arith.constant 0 : index
    %63 = vector.load %arg17[%c0_33, %c0_34] : memref<4x4xf32, #tpu.memory_space<vmem>>, vector<4x4xf32>
    %cst_35 = arith.constant dense<0.000000e+00> : vector<4x4xf32>
    %64 = tpu.matmul %60, %63, %cst_35 {dimension_numbers = #tpu.dot_dimension_numbers<[1], [0], [0], [1], [0, 0, 1, 1], [], []>} : vector<4x4xf32>, vector<4x4xf32>, vector<4x4xf32> -> vector<4x4xf32>
    %65 = arith.addf %62, %64 : vector<4x4xf32>
    %c0_36 = arith.constant 0 : index
    %c0_37 = arith.constant 0 : index
    %66 = vector.load %arg19[%c0_36, %c0_37] : memref<1x4xf32, #tpu.memory_space<vmem>>, vector<1x4xf32>
    %67 = vector.broadcast %66 : vector<1x4xf32> to vector<4x4xf32>
    %68 = arith.addf %65, %67 : vector<4x4xf32>
    %c0_38 = arith.constant 0 : index
    %c0_39 = arith.constant 0 : index
    %69 = vector.load %arg6[%c0_38, %c0_39] : memref<4x24xf32, #tpu.memory_space<vmem>>, vector<4x24xf32>
    %cst_40 = arith.constant dense<0.000000e+00> : vector<4x24xf32>
    %70 = tpu.matmul %68, %69, %cst_40 {dimension_numbers = #tpu.dot_dimension_numbers<[1], [0], [0], [1], [0, 0, 1, 1], [], []>} : vector<4x4xf32>, vector<4x24xf32>, vector<4x24xf32> -> vector<4x24xf32>
    %c0_41 = arith.constant 0 : index
    %c0_42 = arith.constant 0 : index
    %71 = vector.load %arg9[%c0_41, %c0_42] : memref<1x24xf32, #tpu.memory_space<vmem>>, vector<1x24xf32>
    %72 = vector.broadcast %71 : vector<1x24xf32> to vector<4x24xf32>
    %73 = arith.addf %70, %72 : vector<4x24xf32>
    %74 = vector.shape_cast %73 : vector<4x24xf32> to vector<1x1x4x24xf32>
    %c0_43 = arith.constant 0 : index
    %c0_44 = arith.constant 0 : index
    %c0_45 = arith.constant 0 : index
    %c0_46 = arith.constant 0 : index
    %75 = vector.load %arg24[%c0_43, %c0_44, %c0_45, %c0_46] : memref<1x1x4x24xf32, #tpu.memory_space<vmem>>, vector<1x1x4x24xf32>
    tpu.vector_store %arg24[%c0_43, %c0_44, %c0_45, %c0_46], %74 {strides = array<i32>} : memref<1x1x4x24xf32, #tpu.memory_space<vmem>>, vector<1x1x4x24xf32>,
    %cst_47 = arith.constant dense<0.000000e+00> : vector<4xf32>
    %76 = vector.multi_reduction <add>, %73, %cst_47 [1] : vector<4x24xf32> to vector<4xf32>
    %77 = vector.shape_cast %76 : vector<4xf32> to vector<4x1xf32>
    %cst_48 = arith.constant dense<0.000000e+00> : vector<1xf32>
    %78 = vector.multi_reduction <add>, %77, %cst_48 [0] : vector<4x1xf32> to vector<1xf32>
    %79 = vector.shape_cast %78 : vector<1xf32> to vector<1x1xf32>
    %cst_49 = arith.constant 0.010416667 : f32
    %80 = vector.broadcast %cst_49 : f32 to vector<1x1xf32>
    %81 = arith.mulf %79, %80 : vector<1x1xf32>
    %82 = vector.broadcast %81 : vector<1x1xf32> to vector<4x24xf32>
    %83 = arith.subf %73, %82 : vector<4x24xf32>
    %84 = arith.mulf %83, %83 : vector<4x24xf32>
    %cst_50 = arith.constant dense<0.000000e+00> : vector<4xf32>
    %85 = vector.multi_reduction <add>, %84, %cst_50 [1] : vector<4x24xf32> to vector<4xf32>
    %86 = vector.shape_cast %85 : vector<4xf32> to vector<4x1xf32>
    %cst_51 = arith.constant dense<0.000000e+00> : vector<1xf32>
    %87 = vector.multi_reduction <add>, %86, %cst_51 [0] : vector<4x1xf32> to vector<1xf32>
    %88 = vector.shape_cast %87 : vector<1xf32> to vector<1x1xf32>
    %cst_52 = arith.constant 0.010416667 : f32
    %89 = vector.broadcast %cst_52 : f32 to vector<1x1xf32>
    %90 = arith.mulf %88, %89 : vector<1x1xf32>
    %cst_53 = arith.constant 9.99999974E-6 : f32
    %91 = vector.broadcast %cst_53 : f32 to vector<1x1xf32>
    %92 = arith.addf %90, %91 : vector<1x1xf32>
    %93 = math.rsqrt %92 : vector<1x1xf32>
    %94 = vector.broadcast %93 : vector<1x1xf32> to vector<4x24xf32>
    %95 = arith.mulf %83, %94 : vector<4x24xf32>
    %96 = vector.broadcast %1 : f32 to vector<4x24xf32>
    %97 = arith.mulf %95, %96 : vector<4x24xf32>
    %98 = vector.broadcast %3 : f32 to vector<4x24xf32>
    %99 = arith.addf %97, %98 : vector<4x24xf32>
    %c0_54 = arith.constant 0 : index
    %c0_55 = arith.constant 0 : index
    %100 = vector.load %arg12[%c0_54, %c0_55] : memref<24x4xf32, #tpu.memory_space<vmem>>, vector<24x4xf32>
    %cst_56 = arith.constant dense<0.000000e+00> : vector<4x4xf32>
    %101 = tpu.matmul %99, %100, %cst_56 {dimension_numbers = #tpu.dot_dimension_numbers<[1], [0], [0], [1], [0, 0, 1, 1], [], []>} : vector<4x24xf32>, vector<24x4xf32>, vector<4x4xf32> -> vector<4x4xf32>
    %c0_57 = arith.constant 0 : index
    %c0_58 = arith.constant 0 : index
    %102 = vector.load %arg14[%c0_57, %c0_58] : memref<1x4xf32, #tpu.memory_space<vmem>>, vector<1x4xf32>
    %103 = vector.broadcast %102 : vector<1x4xf32> to vector<4x4xf32>
    %104 = arith.addf %101, %103 : vector<4x4xf32>
    %105 = tpu.iota {dimensions = array<i32: 1>} : vector<2x4xi32>
    %106 = tpu.iota {dimensions = array<i32: 0>} : vector<2x4xi32>
    %c2_i32_59 = arith.constant 2 : i32
    %107 = vector.broadcast %c2_i32_59 : i32 to vector<2x4xi32>
    %108 = arith.muli %107, %106 : vector<2x4xi32>
    %109 = arith.cmpi eq, %105, %108 : vector<2x4xi32>
    %110 = arith.extui %109 : vector<2x4xi1> to vector<2x4xi32>
    %111 = arith.sitofp %110 : vector<2x4xi32> to vector<2x4xf32>
    %c1_i32_60 = arith.constant 1 : i32
    %112 = vector.broadcast %c1_i32_60 : i32 to vector<2x4xi32>
    %113 = arith.addi %108, %112 : vector<2x4xi32>
    %114 = arith.cmpi eq, %105, %113 : vector<2x4xi32>
    %115 = arith.extui %114 : vector<2x4xi1> to vector<2x4xi32>
    %116 = arith.sitofp %115 : vector<2x4xi32> to vector<2x4xf32>
    %cst_61 = arith.constant dense<0.000000e+00> : vector<2x4xf32>
    %117 = tpu.matmul %111, %104, %cst_61 {dimension_numbers = #tpu.dot_dimension_numbers<[1], [0], [0], [1], [0, 0, 1, 1], [], []>} : vector<2x4xf32>, vector<4x4xf32>, vector<2x4xf32> -> vector<2x4xf32>
    %cst_62 = arith.constant dense<0.000000e+00> : vector<2x4xf32>
    %118 = tpu.matmul %116, %104, %cst_62 {dimension_numbers = #tpu.dot_dimension_numbers<[1], [0], [0], [1], [0, 0, 1, 1], [], []>} : vector<2x4xf32>, vector<4x4xf32>, vector<2x4xf32> -> vector<2x4xf32>
    %c0_63 = arith.constant 0 : index
    %c0_64 = arith.constant 0 : index
    %119 = vector.load %arg16[%c0_63, %c0_64] : memref<4x4xf32, #tpu.memory_space<vmem>>, vector<4x4xf32>
    %cst_65 = arith.constant dense<0.000000e+00> : vector<2x4xf32>
    %120 = tpu.matmul %117, %119, %cst_65 {dimension_numbers = #tpu.dot_dimension_numbers<[1], [0], [0], [1], [0, 0, 1, 1], [], []>} : vector<2x4xf32>, vector<4x4xf32>, vector<2x4xf32> -> vector<2x4xf32>
    %c0_66 = arith.constant 0 : index
    %c0_67 = arith.constant 0 : index
    %121 = vector.load %arg18[%c0_66, %c0_67] : memref<4x4xf32, #tpu.memory_space<vmem>>, vector<4x4xf32>
    %cst_68 = arith.constant dense<0.000000e+00> : vector<2x4xf32>
    %122 = tpu.matmul %118, %121, %cst_68 {dimension_numbers = #tpu.dot_dimension_numbers<[1], [0], [0], [1], [0, 0, 1, 1], [], []>} : vector<2x4xf32>, vector<4x4xf32>, vector<2x4xf32> -> vector<2x4xf32>
    %123 = arith.addf %120, %122 : vector<2x4xf32>
    %c0_69 = arith.constant 0 : index
    %c0_70 = arith.constant 0 : index
    %124 = vector.load %arg20[%c0_69, %c0_70] : memref<1x4xf32, #tpu.memory_space<vmem>>, vector<1x4xf32>
    %125 = vector.broadcast %124 : vector<1x4xf32> to vector<2x4xf32>
    %126 = arith.addf %123, %125 : vector<2x4xf32>
    %c0_71 = arith.constant 0 : index
    %c0_72 = arith.constant 0 : index
    %127 = vector.load %arg7[%c0_71, %c0_72] : memref<4x48xf32, #tpu.memory_space<vmem>>, vector<4x48xf32>
    %cst_73 = arith.constant dense<0.000000e+00> : vector<2x48xf32>
    %128 = tpu.matmul %126, %127, %cst_73 {dimension_numbers = #tpu.dot_dimension_numbers<[1], [0], [0], [1], [0, 0, 1, 1], [], []>} : vector<2x4xf32>, vector<4x48xf32>, vector<2x48xf32> -> vector<2x48xf32>
    %c0_74 = arith.constant 0 : index
    %c0_75 = arith.constant 0 : index
    %129 = vector.load %arg10[%c0_74, %c0_75] : memref<1x48xf32, #tpu.memory_space<vmem>>, vector<1x48xf32>
    %130 = vector.broadcast %129 : vector<1x48xf32> to vector<2x48xf32>
    %131 = arith.addf %128, %130 : vector<2x48xf32>
    %132 = vector.shape_cast %131 : vector<2x48xf32> to vector<1x1x2x48xf32>
    %c0_76 = arith.constant 0 : index
    %c0_77 = arith.constant 0 : index
    %c0_78 = arith.constant 0 : index
    %c0_79 = arith.constant 0 : index
    %133 = vector.load %arg25[%c0_76, %c0_77, %c0_78, %c0_79] : memref<1x1x2x48xf32, #tpu.memory_space<vmem>>, vector<1x1x2x48xf32>
    tpu.vector_store %arg25[%c0_76, %c0_77, %c0_78, %c0_79], %132 {strides = array<i32>} : memref<1x1x2x48xf32, #tpu.memory_space<vmem>>, vector<1x1x2x48xf32>,
    return
  }
  func.func @transform_0(%arg0: i32, %arg1: i32) -> (i32, i32, i32, i32) {
    %c0_i32 = arith.constant 0 : i32
    %c0_i32_0 = arith.constant 0 : i32
    %c0_i32_1 = arith.constant 0 : i32
    return %arg0, %arg1, %c0_i32, %c0_i32_0 : i32, i32, i32, i32
  }
  func.func @transform_1(%arg0: i32, %arg1: i32) -> (i32, i32) {
    %c0_i32 = arith.constant 0 : i32
    %c0_i32_0 = arith.constant 0 : i32
    %c0_i32_1 = arith.constant 0 : i32
    return %c0_i32, %c0_i32_0 : i32, i32
  }
  func.func @transform_2(%arg0: i32, %arg1: i32) -> (i32, i32) {
    %c0_i32 = arith.constant 0 : i32
    %c0_i32_0 = arith.constant 0 : i32
    %c0_i32_1 = arith.constant 0 : i32
    return %c0_i32, %c0_i32_0 : i32, i32
  }
  func.func @transform_3(%arg0: i32, %arg1: i32) -> (i32, i32) {
    %c0_i32 = arith.constant 0 : i32
    %c0_i32_0 = arith.constant 0 : i32
    %c0_i32_1 = arith.constant 0 : i32
    return %c0_i32, %c0_i32_0 : i32, i32
  }
  func.func @transform_4(%arg0: i32, %arg1: i32) -> (i32, i32) {
    %c0_i32 = arith.constant 0 : i32
    %c0_i32_0 = arith.constant 0 : i32
    %c0_i32_1 = arith.constant 0 : i32
    return %c0_i32, %c0_i32_0 : i32, i32
  }
  func.func @transform_5(%arg0: i32, %arg1: i32) -> (i32, i32) {
    %c0_i32 = arith.constant 0 : i32
    %c0_i32_0 = arith.constant 0 : i32
    %c0_i32_1 = arith.constant 0 : i32
    return %c0_i32, %c0_i32_0 : i32, i32
  }
  func.func @transform_6(%arg0: i32, %arg1: i32) -> (i32, i32) {
    %c0_i32 = arith.constant 0 : i32
    %c0_i32_0 = arith.constant 0 : i32
    %c0_i32_1 = arith.constant 0 : i32
    return %c0_i32, %c0_i32_0 : i32, i32
  }
  func.func @transform_7(%arg0: i32, %arg1: i32) -> (i32, i32) {
    %c0_i32 = arith.constant 0 : i32
    %c0_i32_0 = arith.constant 0 : i32
    %c0_i32_1 = arith.constant 0 : i32
    return %c0_i32, %c0_i32_0 : i32, i32
  }
  func.func @transform_8(%arg0: i32, %arg1: i32) -> (i32, i32) {
    %c0_i32 = arith.constant 0 : i32
    %c0_i32_0 = arith.constant 0 : i32
    %c0_i32_1 = arith.constant 0 : i32
    return %c0_i32, %c0_i32_0 : i32, i32
  }
  func.func @transform_9(%arg0: i32, %arg1: i32) -> (i32, i32) {
    %c0_i32 = arith.constant 0 : i32
    %c0_i32_0 = arith.constant 0 : i32
    %c0_i32_1 = arith.constant 0 : i32
    return %c0_i32, %c0_i32_0 : i32, i32
  }
  func.func @transform_10(%arg0: i32, %arg1: i32) -> (i32, i32) {
    %c0_i32 = arith.constant 0 : i32
    %c0_i32_0 = arith.constant 0 : i32
    %c0_i32_1 = arith.constant 0 : i32
    return %c0_i32, %c0_i32_0 : i32, i32
  }
  func.func @transform_11(%arg0: i32, %arg1: i32) -> (i32, i32) {
    %c0_i32 = arith.constant 0 : i32
    %c0_i32_0 = arith.constant 0 : i32
    %c0_i32_1 = arith.constant 0 : i32
    return %c0_i32, %c0_i32_0 : i32, i32
  }
  func.func @transform_12(%arg0: i32, %arg1: i32) -> (i32, i32) {
    %c0_i32 = arith.constant 0 : i32
    %c0_i32_0 = arith.constant 0 : i32
    %c0_i32_1 = arith.constant 0 : i32
    return %c0_i32, %c0_i32_0 : i32, i32
  }
  func.func @transform_13(%arg0: i32, %arg1: i32) -> (i32, i32) {
    %c0_i32 = arith.constant 0 : i32
    %c0_i32_0 = arith.constant 0 : i32
    %c0_i32_1 = arith.constant 0 : i32
    return %c0_i32, %c0_i32_0 : i32, i32
  }
  func.func @transform_14(%arg0: i32, %arg1: i32) -> (i32, i32) {
    %c0_i32 = arith.constant 0 : i32
    %c0_i32_0 = arith.constant 0 : i32
    %c0_i32_1 = arith.constant 0 : i32
    return %c0_i32, %c0_i32_0 : i32, i32
  }
  func.func @transform_15(%arg0: i32, %arg1: i32) -> (i32, i32) {
    %c0_i32 = arith.constant 0 : i32
    %c0_i32_0 = arith.constant 0 : i32
    %c0_i32_1 = arith.constant 0 : i32
    return %c0_i32, %c0_i32_0 : i32, i32
  }
  func.func @transform_16(%arg0: i32, %arg1: i32) -> (i32, i32) {
    %c0_i32 = arith.constant 0 : i32
    %c0_i32_0 = arith.constant 0 : i32
    %c0_i32_1 = arith.constant 0 : i32
    return %c0_i32, %c0_i32_0 : i32, i32
  }
  func.func @transform_17(%arg0: i32, %arg1: i32) -> (i32, i32) {
    %c0_i32 = arith.constant 0 : i32
    %c0_i32_0 = arith.constant 0 : i32
    %c0_i32_1 = arith.constant 0 : i32
    return %c0_i32, %c0_i32_0 : i32, i32
  }
  func.func @transform_18(%arg0: i32, %arg1: i32) -> (i32, i32) {
    %c0_i32 = arith.constant 0 : i32
    %c0_i32_0 = arith.constant 0 : i32
    %c0_i32_1 = arith.constant 0 : i32
    return %c0_i32, %c0_i32_0 : i32, i32
  }
  func.func @transform_19(%arg0: i32, %arg1: i32) -> i32 {
    %c0_i32 = arith.constant 0 : i32
    %c0_i32_0 = arith.constant 0 : i32
    return %c0_i32 : i32
  }
  func.func @transform_20(%arg0: i32, %arg1: i32) -> i32 {
    %c0_i32 = arith.constant 0 : i32
    %c0_i32_0 = arith.constant 0 : i32
    return %c0_i32 : i32
  }
  func.func @transform_21(%arg0: i32, %arg1: i32) -> (i32, i32, i32, i32) {
    %c0_i32 = arith.constant 0 : i32
    %c0_i32_0 = arith.constant 0 : i32
    %c0_i32_1 = arith.constant 0 : i32
    return %arg0, %arg1, %c0_i32, %c0_i32_0 : i32, i32, i32, i32
  }
  func.func @transform_22(%arg0: i32, %arg1: i32) -> (i32, i32, i32, i32) {
    %c0_i32 = arith.constant 0 : i32
    %c0_i32_0 = arith.constant 0 : i32
    %c0_i32_1 = arith.constant 0 : i32
    return %arg0, %arg1, %c0_i32, %c0_i32_0 : i32, i32, i32, i32
  }
  func.func @transform_23(%arg0: i32, %arg1: i32) -> (i32, i32, i32, i32) {
    %c0_i32 = arith.constant 0 : i32
    %c0_i32_0 = arith.constant 0 : i32
    %c0_i32_1 = arith.constant 0 : i32
    return %arg0, %arg1, %c0_i32, %c0_i32_0 : i32, i32, i32, i32
  }
}

</mosaic_0001>

<bundles_post_ra>
// kernel: encoder_map_forward.1
= control target key start
LH: loop header
LB: loop body
LE: loop exit
PB: predicated region body
PF: predicated region fallthrough
CT: control target
= control target key end

     0   :  { %s2944_s0 = inlined_call_operand.vmem [shape: f32[2,3,8,12], index: 0, kind: input, shape index: {}]   ;;  %s2945_s1 = inlined_call_operand.vmem [shape: f32[12,4], index: 1, kind: input, shape index: {}]   ;;  %s2946_s2 = inlined_call_operand.vmem [shape: f32[1,4], index: 2, kind: input, shape index: {}]   ;;  %s2947_s3 = inlined_call_operand.vmem [shape: f32[4,12], index: 3, kind: input, shape index: {}]   ;;  %s2948_s4 = inlined_call_operand.vmem [shape: f32[4,24], index: 4, kind: input, shape index: {}]   ;;  %s2949_s5 = inlined_call_operand.vmem [shape: f32[4,48], index: 5, kind: input, shape index: {}]   ;;  %s2950_s6 = inlined_call_operand.vmem [shape: f32[1,12], index: 6, kind: input, shape index: {}]   ;;  %s2951_s7 = inlined_call_operand.vmem [shape: f32[1,24], index: 7, kind: input, shape index: {}]   ;;  %s2952_s8 = inlined_call_operand.vmem [shape: f32[1,48], index: 8, kind: input, shape index: {}]   ;;  %s2953_s9 = inlined_call_operand.vmem [shape: f32[12,4], index: 9, kind: input, shape index: {}]   ;;  %s2954_s10 = inlined_call_operand.vmem [shape: f32[24,4], index: 10, kind: input, shape index: {}]   ;;  %s2955_s11 = inlined_call_operand.vmem [shape: f32[1,4], index: 11, kind: input, shape index: {}]   ;;  %s2956_s12 = inlined_call_operand.vmem [shape: f32[1,4], index: 12, kind: input, shape index: {}]   ;;  %s2957_s13 = inlined_call_operand.vmem [shape: f32[4,4], index: 13, kind: input, shape index: {}]   ;;  %s2958_s14 = inlined_call_operand.vmem [shape: f32[4,4], index: 14, kind: input, shape index: {}]   ;;  %s2959_s15 = inlined_call_operand.vmem [shape: f32[4,4], index: 15, kind: input, shape index: {}]   ;;  %s2960_s16 = inlined_call_operand.vmem [shape: f32[4,4], index: 16, kind: input, shape index: {}]   ;;  %s2961_s17 = inlined_call_operand.vmem [shape: f32[1,4], index: 17, kind: input, shape index: {}]   ;;  %s2962_s18 = inlined_call_operand.vmem [shape: f32[1,4], index: 18, kind: input, shape index: {}]   ;;  %s2963_s19 = inlined_call_operand.vmem [shape: f32[3], index: 19, kind: input, shape index: {}]   ;;  %s2964_s20 = inlined_call_operand.vmem [shape: f32[3], index: 20, kind: input, shape index: {}]   ;;  %s2965_s21 = inlined_call_operand.vmem [shape: f32[2,3,8,12], index: 21, kind: output, shape index: {0}]   ;;  %s2966_s22 = inlined_call_operand.vmem [shape: f32[2,3,4,24], index: 22, kind: output, shape index: {1}]   ;;  %s2967_s23 = inlined_call_operand.vmem [shape: f32[2,3,2,48], index: 23, kind: output, shape index: {2}]  }
   0x1   :  { %2974 = sst [smem:[#allocation10_spill]] %s2944_s0 }
   0x2   :  { %2975 = sst [smem:[#allocation11_spill]] %s2945_s1 }
   0x3   :  { %2976 = sst [smem:[#allocation12_spill]] %s2946_s2 }
   0x4   :  { %2977 = sst [smem:[#allocation13_spill]] %s2947_s3 }
   0x5   :  { %2978 = sst [smem:[#allocation14_spill]] %s2948_s4 }
   0x6   :  { %2979 = sst [smem:[#allocation15_spill]] %s2949_s5 }
   0x7   :  { %2980 = sst [smem:[#allocation16_spill]] %s2950_s6 }
   0x8   :  { %2981 = sst [smem:[#allocation17_spill]] %s2951_s7 }
   0x9   :  { %2982 = sst [smem:[#allocation18_spill]] %s2963_s19 }
   0xa   :  { %29 = vsyncpa [#allocation3], 0 }
   0xb   :  { %30 = vsyncpa [#allocation5], 0  ;;  %s2663_s4 = smov 0   ;;  %s2665_s30 = smov 0  }
   0xc   :  { %s2667_s24 = smov 0   ;;  %s2669_s25 = smov 0  }
   0xd   :  { %s2671_s5 = smov 0  }
   0xe LB: > { %2983 = sst [smem:[#allocation8_spill]] %s2531_s25  ;;  %s2218_s1 = sadd.s32 4294967295, %s2535_s5   ;;  %s2535_s5 = sphi %s2671_s5, %s36_s5   ;;  %s2531_s25 = sphi %s2669_s25, %s3005_s25   ;;  %s2527_s24 = sphi %s2667_s24, %s3004_s24   ;;  %s2523_s30 = sphi %s2665_s30, %s3001_s30   ;;  %s2519_s4 = sphi %s2663_s4, %s3003_s4  }
   0xf   : > { %s45_s26 = sadd.s32 1, %s2527_s24  ;;  %s48_s2 = sadd.s32 1, %s2531_s25 }
  0x10   : > { %p46_p0 = scmp.ge.s32.totalorder %s45_s26, 3  ;;  %p2220_p1 = scmp.ge.s32.totalorder %s2535_s5, 1 }
  0x11   : > { %p585_p2 = scmp.lt.s32.totalorder %s2535_s5, 7  ;;  %p2700_p5 = scmp.eq.s32.totalorder %s2218_s1, 0 }
  0x12   : > { %s3007_s26 = smov (%p46_p0, %s45_s26), 0  ;;  %s3009_s2 = smov (!%p46_p0, %s48_s2), %s2531_s25 }
  0x13   : > { %2984 = sst [smem:[#allocation9_spill]] %s3007_s26  ;;  %p2696_p3 = pnand %p2220_p1, %p585_p2 }
  0x14   : > { %p50_p4 = scmp.ge.s32.totalorder %s3009_s2, 2  ;;  %s2987_s19 = sld [smem:[#allocation18_spill]] }
  0x15   : > { %s2985_s6 = scalar_select %p2696_p3, 1, 0 }
  0x16   : > { %s2986_s27 = scalar_select %p2700_p5, 1, 0 }
  0x17   : > { %p2398_p6 = pneg %p2696_p3  ;;  %s3011_s2 = smov (%p50_p4, %s3009_s2), 0 }
  0x18   : > { %s663_s26 = sshll.u32 %s2964_s20, 4  ;;  %s664_s26 = int_to_ptr.vmem [resolvable:$true] %s663_s26 }
  0x19   : > { %p2713_p7 = pnand %p2700_p5, %p2398_p6 }
  0x1a   : > { %s652_s29 = sshll.u32 %s2987_s19, 4  ;;  %s653_s29 = int_to_ptr.vmem [resolvable:$true] %s652_s29 }
  0x1b   : > { %s2459_s25 = scalar_lea.vmem %s653_s29, 16  ;;  %p2461_p9 = pneg %p2713_p7 }
  0x1c   : > { %p2460_p8 = scmp.ne.s32.totalorder %s653_s29, %s2459_s25  ;;  %p2467_p12 = scmp.lt.s32.totalorder %s653_s29, %s653_s29 }
  0x1d   : > { %p2468_p13 = scmp.lt.s32.totalorder %s2459_s25, %s2459_s25 }
  0x1e   : > { %p2462_p10 = pnand %p2461_p9, %p2460_p8 }
  0x1f   : > { %p2469_p0 = por %p2468_p13, %p2467_p12 }
  0x20   : > { %p2463_p11 = pneg %p2462_p10 }
  0x22   : > { %p2470_p1 = pnand %p2469_p0, %p2463_p11 }
  0x24   : > { %2473 = shalt.err (!%p2470_p1)
}
  0x25   : > { %s2537_s7 = smov [#allocation2]   ;;  %s2474_s28 = scalar_lea.vmem %s664_s26, 16 }
  0x26   : > { %2401 = dma.vmem_to_smem (!%p2713_p7), %s653_s29, 16, %s2537_s7, [#allocation3]  }
  0x27   : > { %p2475_p2 = scmp.ne.s32.totalorder %s664_s26, %s2474_s28  ;;  %p2482_p5 = scmp.lt.s32.totalorder %s664_s26, %s664_s26 }
  0x28   : > { %p2483_p3 = scmp.lt.s32.totalorder %s2474_s28, %s2474_s28 }
  0x29   : > { %p2477_p4 = pnand %p2475_p2, %p2461_p9 }
  0x2a   : > { %p2484_p8 = por %p2483_p3, %p2482_p5 }
  0x2b   : > { %p2478_p6 = pneg %p2477_p4 }
  0x2d   : > { %p2485_p10 = pnand %p2484_p8, %p2478_p6 }
  0x2f   : > { %2488 = shalt.err (!%p2485_p10)
}
  0x30   : > { %s2538_s0 = smov [#allocation4]   ;;  %p2989_p11 = scmp.ne.s32.totalorder %s2985_s6, 0 }
  0x31   : > { %2404 = dma.vmem_to_smem (!%p2713_p7), %s664_s26, 16, %s2538_s0, [#allocation5]  }
  0x32   : > { %687 = sbr.rel (%p2989_p11) target bundleno = 2897 (0xb51), region = 104  ;;  %p2990_p12 = scmp.ne.s32.totalorder (!%p2989_p11), %s2986_s27, 0 }
  0x39   : > { %2510 = dma.done.wait (%p2990_p12), [#allocation3], 16  }
  0x3a   : > { %2512 = vsyncadd (%p2990_p12), [#allocation3], 4294967280 }
  0x3b   : > { %2514 = dma.done.wait (%p2990_p12), [#allocation5], 16  }
  0x3c   : > { %2516 = vsyncadd (%p2990_p12), [#allocation5], 4294967280 }
  0x3d   : > { %697 = sfence }
  0x3e   : > { %s2991_s3 = sld [smem:[#allocation11_spill]]  ;;  %vm826_vm0 = vcmask 1043456   ;;  %v2539_v2 = vmov 0.0|0.0   ;;  %vm2540_vm1 = vmmov 1   ;;  %p778_p3 = scmp.lt.s32.totalorder %s2523_s30, 1  ;;  %vm2541_vm3 = vmmov 0  }
  0x3f   : > { %2378 = vmatprep.subr.bf16.mxu0 %v2539_v2  ;;  %vm2744_vm2 = vmpackc.low %vm826_vm0, %vm2540_vm1  ;;  %p780_p5 = scmp.lt.s32.totalorder %s2519_s4, 2  ;;  %v2542_v5 = vmov 0.0   ;;  %vm822_vm4 = vcmask 97280   ;;  %s2994_s29 = sld [smem:[#allocation10_spill]]  ;;  %vm908_vm5 = vcmask 31744   ;;  %v1015_v28 = vld [vmem:[%s2953_s9] sm:$0xff]  ;;  %v1100_v46 = vlaneseq }
  0x40   : > { %2304 = vmatprep.mubr.msk.f32.mxu0 %vm2541_vm3, %v2542_v5  ;;  %2307 = vmatprep.subr.mxu1 %v2542_v5  ;;  %s3013_s30 = smov (!%p778_p3, %s2523_s30), 1  ;;  %s2995_s19 = sld [smem:[#allocation13_spill]]  ;;  %v1016_v29 = vld [vmem:[%s2953_s9 + $0x8] sm:$0xf]  ;;  %v2237_v51 = vld [vmem:[%s2955_s11] ss:$0 sm:$0xff] }
  0x41   : > { %2309 = vmatprep.mubr.msk.f32.mxu1 %vm2541_vm3, %v2542_v5  ;;  %s781_s27 = scalar_select %p780_p5, %s2519_s4, 2  ;;  %v2383_v30 = vpack.c.bf16 %v1016_v29, %v1015_v28  ;;  %v1103_v47 = vshrl.u32 %v1100_v46, 7  ;;  %v1101_v49 = vand.u32 127, %v1100_v46  ;;  %vm1112_vm8 = vcmask 64512   ;;  %v1260_v57 = vld [vmem:[%s2959_s15] sm:$0xf] }
  0x42   : > { %s2389_s1 = smul.u32 3, %s3013_s30  ;;  %s2802_s0 = sld [smem:[#allocation4 + %s2519_s4]]  ;;  %v1259_v58 = vld [vmem:[%s2957_s13] sm:$0xf]  ;;  %vm1505_vm9 = vcmask 191488   ;;  %v1538_v28 = vld [vmem:[%s2954_s10 + $0x10] sm:$0xff] }
  0x43   : > { %v1104_v48 = vmul.u32 2, %v1103_v47  ;;  %s2998_s30 = sld [smem:[#allocation14_spill]]  ;;  %vm1546_vm10 = vcmask 195584   ;;  %vm2013_vm11 = vcmask 386048  }
  0x44   : > { %v813_v0 = vld [vmem:[%s2991_s3] sm:$0xff]  ;;  %v814_v1 = vld [vmem:[%s2991_s3 + $0x8] sm:$0xf]  ;;  %s2760_s7 = sadd.s32 %s2389_s1, %s781_s27  ;;  %s2996_s1 = sld [smem:[#allocation12_spill]] }
  0x45   : > { %v2379_v3 = vpack.c.bf16 %v814_v1, %v813_v0  ;;  %s2227_s28 = sshll.u32 %s2760_s7, 3  ;;  %v1108_v50 = vadd.s32 1, %v1104_v48  ;;  %vm1105_vm6 = vcmp.eq.s32.totalorder %v1101_v49, %v1104_v48  ;;  %s2229_s3 = sshll.u32 %s2760_s7, 2 }
  0x46   : > { %s785_s26 = scalar_lea.vmem %s2994_s29, %s2227_s28  ;;  %v900_v7 = vld [vmem:[%s2995_s19] sm:$0xf]  ;;  %s2997_s19 = sld [smem:[#allocation16_spill]]  ;;  %v2817_v55 = vsel %vm1105_vm6, 1.0, %v2542_v5 }
  0x47   : > { %2381 = vmatpush3.bf16.msk.msra.mxu0 %vm2744_vm2, %v2379_v3  ;;  %v812_v6 = vld [vmem:[%s785_s26] sm:$0xff]  ;;  %2308 = vmatpush3.msk.msra.mxu1 %vm826_vm0, %v900_v7  ;;  %s793_s26 = scalar_lea.vmem %s2965_s21, %s2227_s28  ;;  %vm1109_vm7 = vcmp.eq.s32.totalorder %v1101_v49, %v1108_v50  ;;  %s2999_s29 = sld [smem:[#allocation17_spill]] }
  0x48   : > { %2319 = vmatprep.subr.mxu0 %v2542_v5  ;;  %2382 = vmatprep.subr.bf16.mxu1 %v2539_v2  ;;  %v1013_v43 = vstv %s2802_s0  ;;  %v2820_v56 = vsel %vm1109_vm7, 1.0, %v2542_v5  ;;  %s801_s6 = scalar_lea.vmem %s2966_s22, %s2229_s3  ;;  %s2230_s25 = sshll.u32 %s2760_s7, 1 }
  0x49   : > { %v1421_v63 = vld [vmem:[%s2998_s30] sm:$0xf]  ;;  %s809_s28 = scalar_lea.vmem %s2967_s23, %s2230_s25 }
  0x4a   : > { %2305 = vmatmul.mubr.msk.f32.vlgmr.msra.gmra.mrb[0].mxu0 %vm822_vm4, %v812_v6  ;;  %v2231_v8 = vld [vmem:[%s2996_s1] ss:$0 sm:$0xff]  ;;  %s2799_s1 = sld [smem:[#allocation2 + %s2519_s4]] }
  0x4b   : > { %2321 = vmatprep.mubr.msk.f32.mxu0 %vm2541_vm3, %v2542_v5  ;;  %s3000_s4 = sld [smem:[#allocation15_spill]] }
  0x4c   : > { %v2234_v12 = vld [vmem:[%s2997_s19] ss:$0 sm:$0xff] }
  0x50   : > { %v1011_v41 = vstv %s2799_s1 }
 0x11d   : > { %v896_v9 = vpop.f32.mrb[0].mxu0 }
 0x11e   : > { %v897_v10 = vadd.f32 %v2231_v8, %v896_v9  ;;  %v2306_v11 = vpop.f32.mrb[1].mxu0  ;;  %v2249_v8 = vld [vmem:[%s2999_s29] ss:$0 sm:$0xff] }
 0x120   : > { %2310 = vmatmul.mubr.msk.f32.vlgmr.msra.gmra.mrb[0].mxu1 %vm908_vm5, %v897_v10 }
 0x121   : > { %2316 = vmatprep.mubr.msk.f32.mxu1 %vm2541_vm3, %v2542_v5  ;;  %2385 = vmatpush3.bf16.msk.msra.mxu1 %vm2744_vm2, %v2383_v30 }
 0x122   : > { %2324 = vmatprep.subr.mxu1 %v2542_v5 }
 0x1f3   : > { %v981_v13 = vpop.f32.mrb[0].mxu1 }
 0x1f4   : > { %v982_v14 = vadd.f32 %v2234_v12, %v981_v13  ;;  %v2311_v15 = vpop.f32.mrb[1].mxu1 }
 0x1f6   : > { %985 = vst.msk [vmem:[%s793_s26] sm:$0xff] %vm822_vm4, %v982_v14  ;;  %v986_v16 = vsel %vm822_vm4, %v982_v14, 0.0 }
 0x1f7   : > { %987 = vadd.xlane.f32.xlu0 %v986_v16 }
 0x284   : > { %v988_v17 = vpop.xlane.xlu0 %987 }
 0x285   : > { %v989_v18 = vrot.slane %v988_v17, 4 }
 0x287   : > { %v990_v19 = vadd.f32 %v989_v18, %v988_v17 }
 0x289   : > { %v991_v20 = vrot.slane %v990_v19, 2 }
 0x28b   : > { %v992_v21 = vadd.f32 %v991_v20, %v990_v19 }
 0x28d   : > { %v993_v22 = vrot.slane %v992_v21, 1 }
 0x28f   : > { %v994_v23 = vadd.f32 %v993_v22, %v992_v21 }
 0x291   : > { %v995_v24 = vmul.f32 0.010416667, %v994_v23 }
 0x293   : > { %v996_v25 = vsub.f32 %v982_v14, %v995_v24 }
 0x295   : > { %v997_v26 = vmul.f32 %v996_v25, %v996_v25 }
 0x297   : > { %v998_v27 = vsel %vm822_vm4, %v997_v26, 0.0  ;;  %v1537_v26 = vld [vmem:[%s2954_s10 + $0x8] sm:$0xff] }
 0x298   : > { %999 = vadd.xlane.f32.xlu0 %v998_v27 }
 0x325   : > { %v1000_v31 = vpop.xlane.xlu0 %999 }
 0x326   : > { %v1001_v32 = vrot.slane %v1000_v31, 4 }
 0x328   : > { %v1002_v33 = vadd.f32 %v1001_v32, %v1000_v31 }
 0x32a   : > { %v1003_v34 = vrot.slane %v1002_v33, 2 }
 0x32c   : > { %v1004_v35 = vadd.f32 %v1003_v34, %v1002_v33 }
 0x32e   : > { %v1005_v36 = vrot.slane %v1004_v35, 1 }
 0x330   : > { %v1006_v37 = vadd.f32 %v1005_v36, %v1004_v35 }
 0x332   : > { %v1007_v38 = vmul.f32 0.010416667, %v1006_v37 }
 0x334   : > { %v1008_v39 = vadd.f32 1e-05, %v1007_v38 }
 0x336   : > { %2455 = vrsqrt.f32 %v1008_v39 }
 0x340   : > { %v2456_v40 = vpop.eup %2455 }
 0x341   : > { %v1010_v42 = vmul.f32 %v2456_v40, %v996_v25  ;;  %v1536_v25 = vld [vmem:[%s2954_s10] sm:$0xff] }
 0x342   : > { %v2387_v27 = vpack.c.bf16 %v1537_v26, %v1536_v25 }
 0x343   : > { %v1012_v44 = vmul.f32 %v1011_v41, %v1010_v42 }
 0x345   : > { %v1014_v45 = vadd.f32 %v1013_v43, %v1012_v44 }
 0x347   : > { %2317 = vmatmul.mubr.msk.f32.vlgmr.msra.gmra.mrb[2].mxu1 %vm822_vm4, %v1014_v45  ;;  %v2252_v45 = vld [vmem:[%s2956_s12] ss:$0 sm:$0xff] }
 0x348   : > { %2326 = vmatprep.mubr.msk.f32.mxu1 %vm2541_vm3, %v2542_v5 }
 0x41a   : > { %v1096_v52 = vpop.f32.mrb[2].mxu1 }
 0x41b   : > { %v1097_v53 = vadd.f32 %v2237_v51, %v1096_v52  ;;  %v2318_v54 = vpop.f32.mrb[3].mxu1 }
 0x41d   : > { %2320 = vmatpush3.msra.mxu0 %v1097_v53  ;;  %2325 = vmatpush3.msra.mxu1 %v1097_v53  ;;  %v1929_v53 = vld [vmem:[%s3000_s4] sm:$0xf] }
 0x41e   : > { %2322 = vmatmul.mubr.msk.f32.vlgmr.msra.gmra.mrb[2].mxu0 %vm1112_vm8, %v2817_v55  ;;  %2327 = vmatmul.mubr.msk.f32.vlgmr.msra.gmra.mrb[4].mxu1 %vm1112_vm8, %v2820_v56 }
 0x41f   : > { %2329 = vmatprep.subr.mxu0 %v2542_v5  ;;  %2334 = vmatprep.subr.mxu1 %v2542_v5 }
 0x420   : > { %2331 = vmatprep.mubr.msk.f32.mxu0 %vm2541_vm3, %v2542_v5  ;;  %2336 = vmatprep.mubr.msk.f32.mxu1 %vm2541_vm3, %v2542_v5 }
 0x421   : > { %2330 = vmatpush3.msk.msra.mxu0 %vm826_vm0, %v1260_v57  ;;  %2335 = vmatpush3.msk.msra.mxu1 %vm826_vm0, %v1259_v58  ;;  %v2262_v57 = vld [vmem:[%s2962_s18] ss:$0 sm:$0xff] }
 0x422   : > { %2339 = vmatprep.subr.mxu0 %v2542_v5  ;;  %2386 = vmatprep.subr.bf16.mxu1 %v2539_v2  ;;  %v2248_v2 = vld [vmem:[%s2961_s17] ss:$0 sm:$0xff] }
 0x4f1   : > { %v1182_v59 = vpop.f32.mrb[2].mxu0  ;;  %v1255_v60 = vpop.f32.mrb[4].mxu1 }
 0x4f2   : > { %v2323_v61 = vpop.f32.mrb[3].mxu0  ;;  %v2328_v62 = vpop.f32.mrb[5].mxu1  ;;  %2332 = vmatmul.mubr.msk.f32.vlgmr.msra.gmra.mrb[4].mxu0 %vm908_vm5, %v1255_v60  ;;  %2337 = vmatmul.mubr.msk.f32.vlgmr.msra.gmra.mrb[6].mxu1 %vm908_vm5, %v1182_v59 }
 0x4f3   : > { %2341 = vmatprep.mubr.msk.f32.mxu0 %vm2541_vm3, %v2542_v5  ;;  %2350 = vmatprep.mubr.msk.f32.mxu1 %vm2541_vm3, %v2542_v5 }
 0x4f4   : > { %2340 = vmatpush3.msk.msra.mxu0 %vm826_vm0, %v1421_v63  ;;  %2388 = vmatpush3.bf16.msra.mxu1 %v2387_v27 }
 0x4f5   : > { %2353 = vmatprep.subr.mxu0 %v2542_v5  ;;  %2348 = vmatprep.subr.mxu1 %v2542_v5 }
 0x4f8   : > { %2349 = vmatpush3.msra.mxu1 %v1538_v28 }
 0x4f9   : > { %2363 = vmatprep.subr.mxu1 %v2542_v5 }
 0x5c5   : > { %v1333_v0 = vpop.f32.mrb[4].mxu0  ;;  %v1409_v1 = vpop.f32.mrb[6].mxu1 }
 0x5c6   : > { %v1410_v3 = vadd.f32 %v1409_v1, %v1333_v0  ;;  %v2333_v4 = vpop.f32.mrb[5].mxu0  ;;  %v2338_v6 = vpop.f32.mrb[7].mxu1 }
 0x5c8   : > { %v1420_v7 = vadd.f32 %v2248_v2, %v1410_v3 }
 0x5ca   : > { %2342 = vmatmul.mubr.msk.f32.vlgmr.msra.gmra.mrb[6].mxu0 %vm908_vm5, %v1420_v7 }
 0x5cb   : > { %2355 = vmatprep.mubr.msk.f32.mxu0 %vm2541_vm3, %v2542_v5 }
 0x69d   : > { %v1501_v9 = vpop.f32.mrb[6].mxu0 }
 0x69e   : > { %v1502_v10 = vadd.f32 %v2249_v8, %v1501_v9  ;;  %v2343_v11 = vpop.f32.mrb[7].mxu0 }
 0x6a0   : > { %v1507_v12 = vsel %vm1505_vm9, %v1502_v10, 0.0  ;;  %1506 = vst.msk [vmem:[%s801_s6] sm:$0xf] %vm1505_vm9, %v1502_v10 }
 0x6a1   : > { %1508 = vadd.xlane.f32.xlu1 %v1507_v12 }
 0x72e   : > { %v1509_v13 = vpop.xlane.xlu1 %1508 }
 0x72f   : > { %v1510_v14 = vsel %vm826_vm0, %v1509_v13, 0.0 }
 0x730   : > { %v1511_v15 = vrot.slane %v1510_v14, 4 }
 0x732   : > { %v1512_v16 = vadd.f32 %v1511_v15, %v1510_v14 }
 0x734   : > { %v1513_v17 = vrot.slane %v1512_v16, 2 }
 0x736   : > { %v1514_v18 = vadd.f32 %v1513_v17, %v1512_v16 }
 0x738   : > { %v1515_v19 = vrot.slane %v1514_v18, 1 }
 0x73a   : > { %v1516_v20 = vadd.f32 %v1515_v19, %v1514_v18 }
 0x73c   : > { %v1517_v21 = vmul.f32 0.010416667, %v1516_v20 }
 0x73e   : > { %v1518_v22 = vsub.f32 %v1502_v10, %v1517_v21 }
 0x740   : > { %v1519_v23 = vmul.f32 %v1518_v22, %v1518_v22 }
 0x742   : > { %v1520_v24 = vsel %vm1505_vm9, %v1519_v23, 0.0 }
 0x743   : > { %1521 = vadd.xlane.f32.xlu1 %v1520_v24 }
 0x7d0   : > { %v1522_v29 = vpop.xlane.xlu1 %1521 }
 0x7d1   : > { %v1523_v30 = vsel %vm826_vm0, %v1522_v29, 0.0 }
 0x7d2   : > { %v1524_v31 = vrot.slane %v1523_v30, 4 }
 0x7d4   : > { %v1525_v32 = vadd.f32 %v1524_v31, %v1523_v30 }
 0x7d6   : > { %v1526_v33 = vrot.slane %v1525_v32, 2 }
 0x7d8   : > { %v1527_v34 = vadd.f32 %v1526_v33, %v1525_v32 }
 0x7da   : > { %v1528_v35 = vrot.slane %v1527_v34, 1 }
 0x7dc   : > { %v1529_v36 = vadd.f32 %v1528_v35, %v1527_v34 }
 0x7de   : > { %v1530_v37 = vmul.f32 0.010416667, %v1529_v36 }
 0x7e0   : > { %v1531_v38 = vadd.f32 1e-05, %v1530_v37 }
 0x7e2   : > { %2457 = vrsqrt.f32 %v1531_v38 }
 0x7ec   : > { %v2458_v39 = vpop.eup %2457 }
 0x7ed   : > { %v1533_v40 = vmul.f32 %v2458_v39, %v1518_v22 }
 0x7ef   : > { %v1534_v42 = vmul.f32 %v1533_v40, %v1011_v41  ;;  %v1767_v41 = vld [vmem:[%s2958_s14] sm:$0xf] }
 0x7f1   : > { %v1535_v44 = vadd.f32 %v1534_v42, %v1013_v43  ;;  %v1768_v43 = vld [vmem:[%s2960_s16] sm:$0xf] }
 0x7f3   : > { %2351 = vmatmul.mubr.msk.f32.vlgmr.msra.gmra.mrb[8].mxu1 %vm1546_vm10, %v1535_v44 }
 0x7f4   : > { %2365 = vmatprep.mubr.msk.f32.mxu1 %vm2541_vm3, %v2542_v5  ;;  %2364 = vmatpush3.msk.msra.mxu1 %vm826_vm0, %v1768_v43 }
 0x7f5   : > { %2373 = vmatprep.subr.mxu1 %v2542_v5 }
 0x8c6   : > { %v1616_v46 = vpop.f32.mrb[8].mxu1 }
 0x8c7   : > { %v1617_v47 = vadd.f32 %v2252_v45, %v1616_v46  ;;  %v2352_v48 = vpop.f32.mrb[9].mxu1 }
 0x8c9   : > { %2354 = vmatpush3.msk.msra.mxu0 %vm826_vm0, %v1617_v47 }
 0x8ca   : > { %2356 = vmatmul.mubr.msk.f32.vlgmr.msra.gmra.mrb[8].mxu0 %vm908_vm5, %v2817_v55  ;;  %2358 = vmatprep.subr.mxu0 %v2542_v5 }
 0x8cb   : > { %2359 = vmatpush3.msk.msra.mxu0 %vm826_vm0, %v1617_v47  ;;  %2360 = vmatprep.mubr.msk.f32.mxu0 %vm2541_vm3, %v2542_v5 }
 0x8cc   : > { %2368 = vmatprep.subr.mxu0 %v2542_v5 }
 0x8ce   : > { %2361 = vmatmul.mubr.msk.f32.vlgmr.msra.gmra.mrb[10].mxu0 %vm908_vm5, %v2820_v56 }
 0x8cf   : > { %2370 = vmatprep.mubr.msk.f32.mxu0 %vm2541_vm3, %v2542_v5  ;;  %2369 = vmatpush3.msk.msra.mxu0 %vm826_vm0, %v1767_v41 }
 0x99d   : > { %v1691_v49 = vpop.f32.mrb[8].mxu0 }
 0x99e   : > { %v2357_v50 = vpop.f32.mrb[9].mxu0  ;;  %2371 = vmatmul.mubr.msk.f32.vlgmr.msra.gmra.mrb[12].mxu0 %vm908_vm5, %v1691_v49 }
 0x9a1   : > { %v1763_v51 = vpop.f32.mrb[10].mxu0 }
 0x9a2   : > { %2366 = vmatmul.mubr.msk.f32.vlgmr.msra.gmra.mrb[10].mxu1 %vm908_vm5, %v1763_v51  ;;  %v2362_v52 = vpop.f32.mrb[11].mxu0 }
 0x9a3   : > { %2375 = vmatprep.mubr.msk.f32.mxu1 %vm2541_vm3, %v2542_v5  ;;  %2374 = vmatpush3.msk.msra.mxu1 %vm826_vm0, %v1929_v53  ;;  %v2263_v5 = vld [vmem:[%s2952_s8] ss:$0 sm:$0xff] }
 0xa71   : > { %v1917_v54 = vpop.f32.mrb[12].mxu0 }
 0xa72   : > { %v2372_v55 = vpop.f32.mrb[13].mxu0 }
 0xa75   : > { %v1841_v56 = vpop.f32.mrb[10].mxu1 }
 0xa76   : > { %v1918_v58 = vadd.f32 %v1917_v54, %v1841_v56  ;;  %v2367_v59 = vpop.f32.mrb[11].mxu1 }
 0xa78   : > { %v1928_v60 = vadd.f32 %v2262_v57, %v1918_v58 }
 0xa7a   : > { %2376 = vmatmul.mubr.msk.f32.vlgmr.msra.gmra.mrb[12].mxu1 %vm908_vm5, %v1928_v60 }
 0xb4d   : > { %v2009_v61 = vpop.f32.mrb[12].mxu1 }
 0xb4e   : > { %v2010_v62 = vadd.f32 %v2263_v5, %v2009_v61  ;;  %v2377_v63 = vpop.f32.mrb[13].mxu1 }
 0xb50   : > { %2014 = vst.msk [vmem:[%s809_s28] sm:$0x3] %vm2013_vm11, %v2010_v62 }
 0xb51 PF: > { %s36_s5 = sadd.s32 1, %s2535_s5   ;;  %s3001_s30 = sld [smem:[#allocation8_spill]] }
 0xb52   : > { %p33_p7 = scmp.ge.s32.totalorder %s36_s5, 8   ;;  %s3002_s7 = sld [smem:[#allocation9_spill]] }
 0xb53   : > { %s3003_s4 = smov %s2527_s24  ;;  %s3005_s25 = smov %s3011_s2 }
 0xb54   :  { %35 = sbr.rel (!%p33_p7) target bundleno = 14 (0xe), region = 167 }
 0xb58   : > { %s3004_s24 = smov %s3002_s7 }
 0xb5b   :  { %2086 = vsyncpa [#allocation3], 1 }
 0xb5c   :  { %2088 = vsyncpa [#allocation3 + $0x1], 1 }
 0xb5d   :  { %2089 = vsyncpa [#allocation5], 1 }

</bundles_post_ra>
